<compile_context>
chip_gen: v5e
topology: v5e:2x2
jax: 0.10.0
libtpu: 0.0.40
codegen_flags: <defaults>
</compile_context>

<pallas_src>
import functools

import jax
import jax.numpy as jnp
from jax.experimental import pallas as pl
from jax.experimental.pallas import tpu as pltpu


def _pi_activation(x, alpha=0.1):
    # PhysicallyInformedActivation: where(x > 0, x, alpha*(exp(x)-1))
    return jnp.where(x > 0, x, alpha * (jnp.exp(x) - 1.0))


def pinn_kernel(x_ref,
                w0_ref, b0_ref,
                w1_ref, b1_ref,
                w2_ref, b2_ref,
                wo_ref, bo_ref,
                o_ref):
    # x: (static_dim, TB) -- batch on the lane axis.
    x = x_ref[...].astype(jnp.float32)

    # Layer 0: PhysicalConstraintLayer = Linear -> sigmoid * 0.3.
    # (The subsequent PhysicallyInformedActivation is an identity on (0, 0.3).)
    h = jnp.dot(w0_ref[...], x, preferred_element_type=jnp.float32) + b0_ref[...]
    h = jax.nn.sigmoid(h) * 0.3

    # Layer 1: Linear -> PhysicallyInformedActivation
    h = jnp.dot(w1_ref[...], h, preferred_element_type=jnp.float32) + b1_ref[...]
    h = _pi_activation(h, alpha=0.1)

    # Layer 2: Linear -> PhysicallyInformedActivation
    h = jnp.dot(w2_ref[...], h, preferred_element_type=jnp.float32) + b2_ref[...]
    h = _pi_activation(h, alpha=0.1)

    # Output layer: Linear -> relu + 1e-6, stored lane-dense as (2, TB).
    y = jnp.dot(wo_ref[...], h, preferred_element_type=jnp.float32) + bo_ref[...]
    o_ref[...] = jnp.maximum(y, 0.0) + 1e-6


@functools.partial(jax.jit, static_argnames=("tb", "input_dtype"))
def pinn_forward(x, params, *, tb=512, input_dtype=jnp.float32):
    """x: (B, static_dim) float32; params: [(W_in_out, b_1_out)] * 4. Returns (B, 2).

    tb:          batch tile (rounded to a multiple of 128).
    input_dtype: set to jnp.bfloat16 to halve x HBM traffic at scale (kernel casts
                 back to f32; small precision change vs the f32 reference).
    """
    B, static_dim = x.shape
    (w0, b0), (w1, b1), (w2, b2), (wo, bo) = params

    # Batch tile: multiple of 128 lanes, no larger than needed for the batch.
    tb = max(128, 128 * (tb // 128))
    tb = min(tb, 128 * pl.cdiv(B, 128))
    b_pad = tb * pl.cdiv(B, tb)
    grid = (b_pad // tb,)

    # Transposed, lane-dense layouts (tiny host-side reshapes of <10 KB of params).
    x_t = jnp.pad(x, ((0, b_pad - B), (0, 0))).T.astype(input_dtype)  # (static_dim, B_pad)
    w0t, w1t, w2t, wot = w0.T, w1.T, w2.T, wo.T                       # (out, in)
    b0c, b1c, b2c, boc = b0.T, b1.T, b2.T, bo.T                       # (out, 1)

    def const_spec(shape):
        # Full-block, VMEM-resident across all grid steps.
        return pl.BlockSpec(shape, lambda i: (0, 0))

    in_specs = [
        pl.BlockSpec((static_dim, tb), lambda i: (0, i)),   # x tile
        const_spec(w0t.shape), const_spec(b0c.shape),
        const_spec(w1t.shape), const_spec(b1c.shape),
        const_spec(w2t.shape), const_spec(b2c.shape),
        const_spec(wot.shape), const_spec(boc.shape),
    ]
    out_spec = pl.BlockSpec((2, tb), lambda i: (0, i))      # lane-dense output tile

    out_t = pl.pallas_call(
        pinn_kernel,
        out_shape=jax.ShapeDtypeStruct((2, b_pad), jnp.float32),
        grid=grid,
        in_specs=in_specs,
        out_specs=out_spec,
        compiler_params=pltpu.CompilerParams(
            dimension_semantics=("parallel",)),
    )(x_t, w0t, b0c, w1t, b1c, w2t, b2c, wot, boc)

    return out_t.T[:B]                                       # (B, 2)


def init_params(key, static_dim, hidden_dims=(24, 16, 12), out_dim=2):
    """Deterministic init mimicking the PyTorch module.

    _initialize_weights overrides everything with kaiming_normal_
    (nonlinearity='leaky_relu'), biases = 0.01. Weights stored (in, out).
    """
    dims = [static_dim] + list(hidden_dims) + [out_dim]
    params = []
    for i in range(len(dims) - 1):
        key, sub = jax.random.split(key)
        fan_in, fan_out = dims[i], dims[i + 1]
        gain = (2.0 / (1.0 + 0.01 ** 2)) ** 0.5
        std = gain / (fan_in ** 0.5)
        w = std * jax.random.normal(sub, (fan_in, fan_out), dtype=jnp.float32)
        b = jnp.full((1, fan_out), 0.01, dtype=jnp.float32)
        params.append((w, b))
    return params


def pinn_ref(x, params):
    """Pure-JAX reference for correctness checking."""
    (w0, b0), (w1, b1), (w2, b2), (wo, bo) = params
    h = jax.nn.sigmoid(x @ w0 + b0) * 0.3
    h = _pi_activation(h)           # identity on (0, 0.3); kept for fidelity
    h = _pi_activation(h @ w1 + b1)
    h = _pi_activation(h @ w2 + b2)
    y = h @ wo + bo
    return jnp.maximum(y, 0.0) + 1e-6


if __name__ == "__main__":
    key = jax.random.PRNGKey(0)
    static_dim = 8

    k_x, k_p, k_x2 = jax.random.split(key, 3)
    params = init_params(k_p, static_dim)

    # Small-batch case (single tile).
    x_small = jax.random.normal(k_x, (8, static_dim), dtype=jnp.float32)
    out_small = jax.block_until_ready(pinn_forward(x_small, params))
    ref_small = pinn_ref(x_small, params)
    assert out_small.shape == (8, 2), out_small.shape
    assert jnp.allclose(out_small, ref_small, atol=1e-5, rtol=1e-5)

    # Multi-tile case (exercises the batch grid + pipelining + padding path).
    x_big = jax.random.normal(k_x2, (300, static_dim), dtype=jnp.float32)
    out_big = jax.block_until_ready(pinn_forward(x_big, params, tb=128))
    ref_big = pinn_ref(x_big, params)
    assert out_big.shape == (300, 2), out_big.shape
    assert jnp.allclose(out_big, ref_big, atol=1e-5, rtol=1e-5)

    print("KERNEL_OK")
</pallas_src>

<mosaic_0001>
module attributes {stable_mosaic.version = 11 : i64} {
  func.func @pinn_kernel(%arg0: i32, %arg1: memref<8x128xf32, #tpu.memory_space<vmem>>, %arg2: memref<24x8xf32, #tpu.memory_space<vmem>>, %arg3: memref<24x1xf32, #tpu.memory_space<vmem>>, %arg4: memref<16x24xf32, #tpu.memory_space<vmem>>, %arg5: memref<16x1xf32, #tpu.memory_space<vmem>>, %arg6: memref<12x16xf32, #tpu.memory_space<vmem>>, %arg7: memref<12x1xf32, #tpu.memory_space<vmem>>, %arg8: memref<2x12xf32, #tpu.memory_space<vmem>>, %arg9: memref<2x1xf32, #tpu.memory_space<vmem>>, %arg10: memref<2x128xf32, #tpu.memory_space<vmem>>) attributes {dimension_semantics = [#tpu.dimension_semantics<parallel>], iteration_bounds = array<i64: 1>, scalar_prefetch = 0 : i64, scratch_operands = 0 : i64, tpu.core_type = #tpu.core_type<tc>, window_params = [{transform_indices = @transform_0, window_bounds = array<i64: 8, 128>}, {pipeline_mode = #tpu.pipeline_mode<synchronous>, transform_indices = @transform_1, window_bounds = array<i64: 24, 8>}, {pipeline_mode = #tpu.pipeline_mode<synchronous>, transform_indices = @transform_2, window_bounds = array<i64: 24, 1>}, {pipeline_mode = #tpu.pipeline_mode<synchronous>, transform_indices = @transform_3, window_bounds = array<i64: 16, 24>}, {pipeline_mode = #tpu.pipeline_mode<synchronous>, transform_indices = @transform_4, window_bounds = array<i64: 16, 1>}, {pipeline_mode = #tpu.pipeline_mode<synchronous>, transform_indices = @transform_5, window_bounds = array<i64: 12, 16>}, {pipeline_mode = #tpu.pipeline_mode<synchronous>, transform_indices = @transform_6, window_bounds = array<i64: 12, 1>}, {pipeline_mode = #tpu.pipeline_mode<synchronous>, transform_indices = @transform_7, window_bounds = array<i64: 2, 12>}, {pipeline_mode = #tpu.pipeline_mode<synchronous>, transform_indices = @transform_8, window_bounds = array<i64: 2, 1>}, {transform_indices = @transform_9, window_bounds = array<i64: 2, 128>}]} {
    %c0 = arith.constant 0 : index
    %c0_0 = arith.constant 0 : index
    %0 = vector.load %arg1[%c0, %c0_0] : memref<8x128xf32, #tpu.memory_space<vmem>>, vector<8x128xf32>
    %c0_1 = arith.constant 0 : index
    %c0_2 = arith.constant 0 : index
    %1 = vector.load %arg2[%c0_1, %c0_2] : memref<24x8xf32, #tpu.memory_space<vmem>>, vector<24x8xf32>
    %cst = arith.constant dense<0.000000e+00> : vector<24x128xf32>
    %2 = tpu.matmul %1, %0, %cst {dimension_numbers = #tpu.dot_dimension_numbers<[1], [0], [0], [1], [0, 0, 1, 1], [], []>} : vector<24x8xf32>, vector<8x128xf32>, vector<24x128xf32> -> vector<24x128xf32>
    %c0_3 = arith.constant 0 : index
    %c0_4 = arith.constant 0 : index
    %3 = vector.load %arg3[%c0_3, %c0_4] : memref<24x1xf32, #tpu.memory_space<vmem>>, vector<24x1xf32>
    %4 = vector.broadcast %3 : vector<24x1xf32> to vector<24x128xf32>
    %5 = arith.addf %2, %4 : vector<24x128xf32>
    %6 = arith.negf %5 : vector<24x128xf32>
    %7 = math.exp %6 : vector<24x128xf32>
    %cst_5 = arith.constant 1.000000e+00 : f32
    %8 = vector.broadcast %cst_5 : f32 to vector<24x128xf32>
    %9 = arith.addf %8, %7 : vector<24x128xf32>
    %10 = arith.divf %8, %9 : vector<24x128xf32>
    %cst_6 = arith.constant 3.000000e-01 : f32
    %11 = vector.broadcast %cst_6 : f32 to vector<24x128xf32>
    %12 = arith.mulf %10, %11 : vector<24x128xf32>
    %c0_7 = arith.constant 0 : index
    %c0_8 = arith.constant 0 : index
    %13 = vector.load %arg4[%c0_7, %c0_8] : memref<16x24xf32, #tpu.memory_space<vmem>>, vector<16x24xf32>
    %cst_9 = arith.constant dense<0.000000e+00> : vector<16x128xf32>
    %14 = tpu.matmul %13, %12, %cst_9 {dimension_numbers = #tpu.dot_dimension_numbers<[1], [0], [0], [1], [0, 0, 1, 1], [], []>} : vector<16x24xf32>, vector<24x128xf32>, vector<16x128xf32> -> vector<16x128xf32>
    %c0_10 = arith.constant 0 : index
    %c0_11 = arith.constant 0 : index
    %15 = vector.load %arg5[%c0_10, %c0_11] : memref<16x1xf32, #tpu.memory_space<vmem>>, vector<16x1xf32>
    %16 = vector.broadcast %15 : vector<16x1xf32> to vector<16x128xf32>
    %17 = arith.addf %14, %16 : vector<16x128xf32>
    %cst_12 = arith.constant 0.000000e+00 : f32
    %18 = vector.broadcast %cst_12 : f32 to vector<16x128xf32>
    %19 = arith.cmpf ogt, %17, %18 : vector<16x128xf32>
    %20 = math.exp %17 : vector<16x128xf32>
    %cst_13 = arith.constant 1.000000e+00 : f32
    %21 = vector.broadcast %cst_13 : f32 to vector<16x128xf32>
    %22 = arith.subf %20, %21 : vector<16x128xf32>
    %cst_14 = arith.constant 1.000000e-01 : f32
    %23 = vector.broadcast %cst_14 : f32 to vector<16x128xf32>
    %24 = arith.mulf %23, %22 : vector<16x128xf32>
    %25 = arith.select %19, %17, %24 : vector<16x128xi1>, vector<16x128xf32>
    %c0_15 = arith.constant 0 : index
    %c0_16 = arith.constant 0 : index
    %26 = vector.load %arg6[%c0_15, %c0_16] : memref<12x16xf32, #tpu.memory_space<vmem>>, vector<12x16xf32>
    %cst_17 = arith.constant dense<0.000000e+00> : vector<12x128xf32>
    %27 = tpu.matmul %26, %25, %cst_17 {dimension_numbers = #tpu.dot_dimension_numbers<[1], [0], [0], [1], [0, 0, 1, 1], [], []>} : vector<12x16xf32>, vector<16x128xf32>, vector<12x128xf32> -> vector<12x128xf32>
    %c0_18 = arith.constant 0 : index
    %c0_19 = arith.constant 0 : index
    %28 = vector.load %arg7[%c0_18, %c0_19] : memref<12x1xf32, #tpu.memory_space<vmem>>, vector<12x1xf32>
    %29 = vector.broadcast %28 : vector<12x1xf32> to vector<12x128xf32>
    %30 = arith.addf %27, %29 : vector<12x128xf32>
    %cst_20 = arith.constant 0.000000e+00 : f32
    %31 = vector.broadcast %cst_20 : f32 to vector<12x128xf32>
    %32 = arith.cmpf ogt, %30, %31 : vector<12x128xf32>
    %33 = math.exp %30 : vector<12x128xf32>
    %cst_21 = arith.constant 1.000000e+00 : f32
    %34 = vector.broadcast %cst_21 : f32 to vector<12x128xf32>
    %35 = arith.subf %33, %34 : vector<12x128xf32>
    %cst_22 = arith.constant 1.000000e-01 : f32
    %36 = vector.broadcast %cst_22 : f32 to vector<12x128xf32>
    %37 = arith.mulf %36, %35 : vector<12x128xf32>
    %38 = arith.select %32, %30, %37 : vector<12x128xi1>, vector<12x128xf32>
    %c0_23 = arith.constant 0 : index
    %c0_24 = arith.constant 0 : index
    %39 = vector.load %arg8[%c0_23, %c0_24] : memref<2x12xf32, #tpu.memory_space<vmem>>, vector<2x12xf32>
    %cst_25 = arith.constant dense<0.000000e+00> : vector<2x128xf32>
    %40 = tpu.matmul %39, %38, %cst_25 {dimension_numbers = #tpu.dot_dimension_numbers<[1], [0], [0], [1], [0, 0, 1, 1], [], []>} : vector<2x12xf32>, vector<12x128xf32>, vector<2x128xf32> -> vector<2x128xf32>
    %c0_26 = arith.constant 0 : index
    %c0_27 = arith.constant 0 : index
    %41 = vector.load %arg9[%c0_26, %c0_27] : memref<2x1xf32, #tpu.memory_space<vmem>>, vector<2x1xf32>
    %42 = vector.broadcast %41 : vector<2x1xf32> to vector<2x128xf32>
    %43 = arith.addf %40, %42 : vector<2x128xf32>
    %cst_28 = arith.constant 0.000000e+00 : f32
    %44 = vector.broadcast %cst_28 : f32 to vector<2x128xf32>
    %45 = arith.maximumf %43, %44 : vector<2x128xf32>
    %cst_29 = arith.constant 9.99999997E-7 : f32
    %46 = vector.broadcast %cst_29 : f32 to vector<2x128xf32>
    %47 = arith.addf %45, %46 : vector<2x128xf32>
    %c0_30 = arith.constant 0 : index
    %c0_31 = arith.constant 0 : index
    %48 = vector.load %arg10[%c0_30, %c0_31] : memref<2x128xf32, #tpu.memory_space<vmem>>, vector<2x128xf32>
    tpu.vector_store %arg10[%c0_30, %c0_31], %47 {strides = array<i32>} : memref<2x128xf32, #tpu.memory_space<vmem>>, vector<2x128xf32>,
    return
  }
  func.func @transform_0(%arg0: i32) -> (i32, i32) {
    %c0_i32 = arith.constant 0 : i32
    %c0_i32_0 = arith.constant 0 : i32
    return %c0_i32, %arg0 : i32, i32
  }
  func.func @transform_1(%arg0: i32) -> (i32, i32) {
    %c0_i32 = arith.constant 0 : i32
    %c0_i32_0 = arith.constant 0 : i32
    %c0_i32_1 = arith.constant 0 : i32
    return %c0_i32, %c0_i32_0 : i32, i32
  }
  func.func @transform_2(%arg0: i32) -> (i32, i32) {
    %c0_i32 = arith.constant 0 : i32
    %c0_i32_0 = arith.constant 0 : i32
    %c0_i32_1 = arith.constant 0 : i32
    return %c0_i32, %c0_i32_0 : i32, i32
  }
  func.func @transform_3(%arg0: i32) -> (i32, i32) {
    %c0_i32 = arith.constant 0 : i32
    %c0_i32_0 = arith.constant 0 : i32
    %c0_i32_1 = arith.constant 0 : i32
    return %c0_i32, %c0_i32_0 : i32, i32
  }
  func.func @transform_4(%arg0: i32) -> (i32, i32) {
    %c0_i32 = arith.constant 0 : i32
    %c0_i32_0 = arith.constant 0 : i32
    %c0_i32_1 = arith.constant 0 : i32
    return %c0_i32, %c0_i32_0 : i32, i32
  }
  func.func @transform_5(%arg0: i32) -> (i32, i32) {
    %c0_i32 = arith.constant 0 : i32
    %c0_i32_0 = arith.constant 0 : i32
    %c0_i32_1 = arith.constant 0 : i32
    return %c0_i32, %c0_i32_0 : i32, i32
  }
  func.func @transform_6(%arg0: i32) -> (i32, i32) {
    %c0_i32 = arith.constant 0 : i32
    %c0_i32_0 = arith.constant 0 : i32
    %c0_i32_1 = arith.constant 0 : i32
    return %c0_i32, %c0_i32_0 : i32, i32
  }
  func.func @transform_7(%arg0: i32) -> (i32, i32) {
    %c0_i32 = arith.constant 0 : i32
    %c0_i32_0 = arith.constant 0 : i32
    %c0_i32_1 = arith.constant 0 : i32
    return %c0_i32, %c0_i32_0 : i32, i32
  }
  func.func @transform_8(%arg0: i32) -> (i32, i32) {
    %c0_i32 = arith.constant 0 : i32
    %c0_i32_0 = arith.constant 0 : i32
    %c0_i32_1 = arith.constant 0 : i32
    return %c0_i32, %c0_i32_0 : i32, i32
  }
  func.func @transform_9(%arg0: i32) -> (i32, i32) {
    %c0_i32 = arith.constant 0 : i32
    %c0_i32_0 = arith.constant 0 : i32
    return %c0_i32, %arg0 : i32, i32
  }
}

</mosaic_0001>

<bundles_post_ra>
// kernel: pinn_forward.1
= control target key start
LH: loop header
LB: loop body
LE: loop exit
PB: predicated region body
PF: predicated region fallthrough
CT: control target
= control target key end

     0   :  { %vm55_vm0 = vcmask 64512   ;;  %v384_v3 = vmov 0   ;;  %s500_s0 = inlined_call_operand.vmem [shape: f32[8,128], index: 0, kind: input, shape index: {}]   ;;  %s501_s1 = inlined_call_operand.vmem [shape: f32[24,8], index: 1, kind: input, shape index: {}]   ;;  %s502_s2 = inlined_call_operand.vmem [shape: f32[24,1], index: 2, kind: input, shape index: {}]   ;;  %s503_s3 = inlined_call_operand.vmem [shape: f32[16,24], index: 3, kind: input, shape index: {}]   ;;  %s504_s4 = inlined_call_operand.vmem [shape: f32[16,1], index: 4, kind: input, shape index: {}]   ;;  %s505_s5 = inlined_call_operand.vmem [shape: f32[12,16], index: 5, kind: input, shape index: {}]   ;;  %s506_s6 = inlined_call_operand.vmem [shape: f32[12,1], index: 6, kind: input, shape index: {}]   ;;  %s507_s7 = inlined_call_operand.vmem [shape: f32[2,12], index: 7, kind: input, shape index: {}]   ;;  %s508_s8 = inlined_call_operand.vmem [shape: f32[2,1], index: 8, kind: input, shape index: {}]   ;;  %s509_s9 = inlined_call_operand.hbm [shape: f32[2,128], index: 9, kind: output, shape index: {}]  }
   0x1   :  { %v33_v0 = vld [vmem:[%s500_s0] sm:$0xff]  ;;  %v39_v2 = vld [vmem:[%s502_s2 + $0x10] sm:$0xff]  ;;  %335 = vset.pattern.permute.xlu0 %v384_v3  ;;  %336 = vset.pattern.permute.xlu1 %v384_v3 }
   0x2   :  { %v34_v1 = vld [vmem:[%s501_s1] sm:$0xff]  ;;  %80 = vmatpush.msra.mxu0 %v33_v0  ;;  %52 = vperm.xlu0 %335, %v39_v2  }
   0x3   :  { %v37_v4 = vld [vmem:[%s502_s2] sm:$0xff]  ;;  %317 = vmatmul.msk.f32.vlgmr.msra.gmra.mxu0 %vm55_vm0, %v34_v1  ;;  %337 = vset.pattern.permute.xlu2 %v384_v3 }
   0x4   :  { %14 = vsyncpa [#allocation3], 0  ;;  %42 = vperm.xlu1 %336, %v37_v4   ;;  %v35_v5 = vld [vmem:[%s501_s1 + $0x8] sm:$0xff]  ;;  %v36_v8 = vld [vmem:[%s501_s1 + $0x10] sm:$0xff]  ;;  %vm165_vm13 = vcmask 195584   ;;  %s385_s14 = smov [#allocation2]  }
   0x5   :  { %v38_v6 = vld [vmem:[%s502_s2 + $0x8] sm:$0xff]  ;;  %v209_v9 = vld [vmem:[%s506_s6] sm:$0xff]  ;;  %s306_s15 = sshll.u32 %s385_s14, 4  ;;  %s308_s17 = sshll.u32 %s509_s9, 4  ;;  %s307_s15 = int_to_ptr.vmem [resolvable:$true] %s306_s15  ;;  %s309_s17 = int_to_ptr.hbm [resolvable:$true] %s308_s17 }
   0x6   :  { %v154_v7 = vld [vmem:[%s504_s4 + $0x8] sm:$0xff]  ;;  %v264_v10 = vld [vmem:[%s508_s8] sm:$0x3] }
   0x7   :  { %v153_v33 = vld [vmem:[%s504_s4] sm:$0xff]  ;;  %v210_v38 = vld [vmem:[%s506_s6 + $0x8] sm:$0xf] }
   0x8   :  { %157 = vperm.xlu2 %337, %v153_v33   ;;  %v151_v1 = vld [vmem:[%s503_s3] sm:$0xff]  ;;  %v152_v2 = vld [vmem:[%s503_s3 + $0x8] sm:$0xff] }
   0xa   :  { %47 = vperm.xlu0 %335, %v38_v6  }
   0xb   :  { %318 = vmatmul.msk.f32.gmra.mxu0 %vm55_vm0, %v35_v5 }
   0xc   :  { %162 = vperm.xlu1 %336, %v154_v7  }
  0x10   :  { %218 = vperm.xlu2 %337, %v210_v38  }
  0x12   :  { %213 = vperm.xlu0 %335, %v209_v9  }
  0x13   :  { %319 = vmatmul.msk.f32.gmra.mxu0 %vm55_vm0, %v36_v8  ;;  %vm221_vm0 = vcmask 130048  }
  0x14   :  { %267 = vperm.xlu1 %336, %v264_v10  }
  0x62   :  { %v158_v3 = vpop.permute.xlu2 %157 }
  0x74   :  { %v53_v11 = vpop.permute.xlu0 %52 }
  0x76   :  { %v43_v12 = vpop.permute.xlu1 %42 }
  0x7c   :  { %v48_v16 = vpop.permute.xlu0 %47 }
  0x7e   :  { %v163_v7 = vpop.permute.xlu1 %162 }
  0x80   :  { %v82_v13 = vpop.f32.mrf.mxu0 }
  0x81   :  { %v83_v14 = vadd.f32 %v82_v13, %v43_v12 }
  0x83   :  { %v320_v15 = vmul.f32 -1.442695, %v83_v14 }
  0x85   :  { %338 = vpow2.f32 %v320_v15 }
  0x86   :  { %v268_v38 = vpop.permute.xlu1 %267 }
  0x88   :  { %v85_v17 = vpop.f32.mrf.mxu0 }
  0x89   :  { %v86_v18 = vadd.f32 %v85_v17, %v48_v16 }
  0x8b   :  { %v321_v19 = vmul.f32 -1.442695, %v86_v18  ;;  %v339_v20 = vpop.eup %338  ;;  %v207_v18 = vld [vmem:[%s505_s5] sm:$0xff] }
  0x8c   :  { %v100_v21 = vadd.f32 1.0, %v339_v20  ;;  %v208_v20 = vld [vmem:[%s505_s5 + $0x8] sm:$0xf] }
  0x8d   :  { %340 = vpow2.f32 %v321_v19 }
  0x8e   :  { %342 = vrcp.f32 %v100_v21  ;;  %vm108_vm6 = vweird.f32 %v100_v21  ;;  %v114_v50 = vand.u32 2147483648, %v100_v21  ;;  %v112_v53 = vand.u32 2147483647, %v100_v21 }
  0x90   :  { %v88_v22 = vpop.f32.mrf.mxu0  ;;  %v115_v60 = vor.u32 1.1754944e-38, %v114_v50  ;;  %vm113_vm12 = vcmp.eq.f32.partialorder %v112_v53, 8.507059e+37 }
  0x91   :  { %v89_v23 = vadd.f32 %v88_v22, %v53_v11 }
  0x93   :  { %v341_v24 = vpop.eup %340  ;;  %v322_v25 = vmul.f32 -1.442695, %v89_v23 }
  0x94   :  { %v101_v26 = vadd.f32 1.0, %v341_v24  ;;  %v343_v27 = vpop.eup %342 }
  0x95   :  { %344 = vpow2.f32 %v322_v25  ;;  %v104_v32 = vmul.f32 %v343_v27, %v100_v21  ;;  %vm109_vm2 = vweird.f32 %v343_v27  ;;  %v214_v21 = vpop.permute.xlu0 %213  ;;  %v219_v25 = vpop.permute.xlu2 %218 }
  0x96   :  { %346 = vrcp.f32 %v101_v26  ;;  %vm123_vm3 = vweird.f32 %v101_v26  ;;  %v127_v44 = vand.u32 2147483647, %v101_v26  ;;  %v129_v45 = vand.u32 2147483648, %v101_v26  ;;  %vm110_vm8 = vmor %vm108_vm6, %vm109_vm2 }
  0x97   :  { %v105_v35 = vsub.f32 1.0, %v104_v32 }
  0x98   :  { %v130_v55 = vor.u32 1.1754944e-38, %v129_v45  ;;  %vm128_vm11 = vcmp.eq.f32.partialorder %v127_v44, 8.507059e+37 }
  0x99   :  { %v106_v40 = vmul.f32 %v343_v27, %v105_v35 }
  0x9b   :  { %v345_v28 = vpop.eup %344  ;;  %v107_v48 = vadd.f32 %v343_v27, %v106_v40 }
  0x9c   :  { %v347_v29 = vpop.eup %346  ;;  %v102_v30 = vadd.f32 1.0, %v345_v28 }
  0x9d   :  { %v119_v31 = vmul.f32 %v347_v29, %v101_v26  ;;  %vm124_vm1 = vweird.f32 %v347_v29  ;;  %v111_v57 = vsel %vm110_vm8, %v343_v27, %v107_v48 }
  0x9e   :  { %348 = vrcp.f32 %v102_v30  ;;  %v144_v43 = vand.u32 2147483648, %v102_v30  ;;  %v142_v47 = vand.u32 2147483647, %v102_v30  ;;  %vm475_vm5 = vmor %vm123_vm3, %vm124_vm1  ;;  %vm138_vm7 = vweird.f32 %v102_v30 }
  0x9f   :  { %v120_v34 = vsub.f32 1.0, %v119_v31  ;;  %v116_v62 = vsel %vm113_vm12, %v115_v60, %v111_v57  ;;  %vm274_vm1 = vcmask 1043456  }
  0xa0   :  { %v145_v54 = vor.u32 1.1754944e-38, %v144_v43  ;;  %vm143_vm10 = vcmp.eq.f32.partialorder %v142_v47, 8.507059e+37  ;;  %v148_v0 = vmul.f32 0.3, %v116_v62 }
  0xa1   :  { %v121_v36 = vmul.f32 %v347_v29, %v120_v34 }
  0xa3   :  { %v122_v42 = vadd.f32 %v347_v29, %v121_v36  ;;  %v263_v36 = vld [vmem:[%s507_s7] sm:$0x3] }
  0xa4   :  { %v349_v37 = vpop.eup %348 }
  0xa5   :  { %v134_v39 = vmul.f32 %v349_v37, %v102_v30  ;;  %vm139_vm4 = vweird.f32 %v349_v37  ;;  %v126_v52 = vsel %vm475_vm5, %v347_v29, %v122_v42 }
  0xa6   :  { %vm140_vm9 = vmor %vm138_vm7, %vm139_vm4  ;;  %v131_v59 = vsel %vm128_vm11, %v130_v55, %v126_v52  ;;  %vm270_vm4 = vcmask 97280  }
  0xa7   :  { %v135_v41 = vsub.f32 1.0, %v134_v39  ;;  %v149_v63 = vmul.f32 0.3, %v131_v59 }
  0xa9   :  { %v136_v46 = vmul.f32 %v349_v37, %v135_v41 }
  0xab   :  { %v137_v51 = vadd.f32 %v349_v37, %v136_v46 }
  0xad   :  { %v141_v56 = vsel %vm140_vm9, %v349_v37, %v137_v51 }
  0xae   :  { %v146_v58 = vsel %vm143_vm10, %v145_v54, %v141_v56 }
  0xaf   :  { %v150_v61 = vmul.f32 0.3, %v146_v58 }
  0xb1   :  { %185 = vmatpush.msra.mxu1 %v150_v61 }
  0xb3   :  { %186 = vmatpush.msra.mxu1 %v149_v63 }
  0xb5   :  { %187 = vmatpush.msra.mxu1 %v148_v0 }
  0xb6   :  { %323 = vmatmul.msk.f32.vlgmr.msra.gmra.mxu1 %vm165_vm13, %v151_v1 }
  0xbe   :  { %324 = vmatmul.msk.f32.gmra.mxu1 %vm165_vm13, %v152_v2 }
 0x133   :  { %v189_v4 = vpop.f32.mrf.mxu1 }
 0x134   :  { %v190_v5 = vadd.f32 %v189_v4, %v158_v3 }
 0x136   :  { %v197_v6 = vmul.f32 1.442695, %v190_v5  ;;  %vm195_vm15 = vcmp.gt.f32.partialorder %v190_v5, 0.0 }
 0x138   :  { %350 = vpow2.f32 %v197_v6 }
 0x13b   :  { %v192_v8 = vpop.f32.mrf.mxu1 }
 0x13c   :  { %v193_v9 = vadd.f32 %v192_v8, %v163_v7 }
 0x13e   :  { %v199_v10 = vmul.f32 1.442695, %v193_v9  ;;  %v351_v11 = vpop.eup %350  ;;  %vm196_vm14 = vcmp.gt.f32.partialorder %v193_v9, 0.0 }
 0x13f   :  { %v325_v12 = vadd.f32 -1.0, %v351_v11 }
 0x140   :  { %352 = vpow2.f32 %v199_v10 }
 0x141   :  { %v203_v16 = vmul.f32 0.1, %v325_v12 }
 0x143   :  { %v205_v19 = vsel %vm195_vm15, %v190_v5, %v203_v16 }
 0x146   :  { %v353_v13 = vpop.eup %352 }
 0x147   :  { %v326_v14 = vadd.f32 -1.0, %v353_v13 }
 0x149   :  { %v204_v15 = vmul.f32 0.1, %v326_v14 }
 0x14b   :  { %v206_v17 = vsel %vm196_vm14, %v193_v9, %v204_v15 }
 0x14c   :  { %242 = vmatpush.msra.mxu2 %v206_v17 }
 0x14e   :  { %243 = vmatpush.msra.mxu2 %v205_v19 }
 0x14f   :  { %327 = vmatmul.msk.f32.vlgmr.msra.gmra.mxu2 %vm221_vm0, %v207_v18 }
 0x157   :  { %328 = vmatmul.msk.f32.gmra.mxu2 %vm221_vm0, %v208_v20 }
 0x1d2   :  { %v245_v22 = vpop.f32.mrf.mxu2 }
 0x1d3   :  { %v246_v23 = vadd.f32 %v245_v22, %v214_v21 }
 0x1d5   :  { %v253_v24 = vmul.f32 1.442695, %v246_v23  ;;  %vm251_vm3 = vcmp.gt.f32.partialorder %v246_v23, 0.0 }
 0x1d7   :  { %354 = vpow2.f32 %v253_v24 }
 0x1da   :  { %v248_v26 = vpop.f32.mrf.mxu2 }
 0x1db   :  { %v249_v27 = vadd.f32 %v248_v26, %v219_v25 }
 0x1dd   :  { %v255_v28 = vmul.f32 1.442695, %v249_v27  ;;  %v355_v29 = vpop.eup %354  ;;  %vm252_vm2 = vcmp.gt.f32.partialorder %v249_v27, 0.0 }
 0x1de   :  { %v329_v30 = vadd.f32 -1.0, %v355_v29 }
 0x1df   :  { %356 = vpow2.f32 %v255_v28 }
 0x1e0   :  { %v259_v34 = vmul.f32 0.1, %v329_v30 }
 0x1e2   :  { %v261_v37 = vsel %vm251_vm3, %v246_v23, %v259_v34 }
 0x1e5   :  { %v357_v31 = vpop.eup %356 }
 0x1e6   :  { %v330_v32 = vadd.f32 -1.0, %v357_v31 }
 0x1e8   :  { %v260_v33 = vmul.f32 0.1, %v330_v32 }
 0x1ea   :  { %v262_v35 = vsel %vm252_vm2, %v249_v27, %v260_v33 }
 0x1eb   :  { %331 = vmatpush.msk.msra.mxu3 %vm274_vm1, %v262_v35 }
 0x1ed   :  { %293 = vmatpush.msra.mxu3 %v261_v37 }
 0x1ee   :  { %332 = vmatmul.msk.f32.vlgmr.msra.gmra.mxu3 %vm270_vm4, %v263_v36 }
 0x271   :  { %v295_v39 = vpop.f32.mrf.mxu3 }
 0x272   :  { %v296_v40 = vadd.f32 %v295_v39, %v268_v38 }
 0x274   :  { %v298_v41 = vmax.f32 %v296_v40, 0.0 }
 0x276   :  { %v299_v42 = vadd.f32 1e-06, %v298_v41 }
 0x278   :  { %300 = vst [vmem:[#allocation2] sm:$0x3] %v299_v42 }
 0x279   :  { %311 = dma.vmem_to_hbm [thread:$0]  %s307_s15, 32, %s309_s17, [#allocation3]  }
 0x27a   :  { %382 = dma.done.wait [#allocation3], 32  }
 0x27b   :  { %383 = vsyncadd [#allocation3], 4294967264 }
 0x27c   :  { %316 = vsyncpa [#allocation3], 1 }

</bundles_post_ra>
